<compile_context>
chip_gen: v5e
topology: v5e:2x2
jax: 0.10.0
libtpu: 0.0.40
codegen_flags: <defaults>
</compile_context>

<pallas_src>
import functools

import jax
import jax.numpy as jnp
from jax.experimental import pallas as pl
from jax.experimental.pallas import tpu as pltpu

_LANES = 128
_MAX_BLOCK_BYTES = 4 * 1024 * 1024      # data bytes per block
_VMEM_LIMIT_BYTES = 32 * 1024 * 1024    # >= 4x block (in + out double buffer)


def line_kernel(p_ref, x_ref, o_ref):
    # p_ref: (1, 2) f32 in SMEM -> [m, b].  Compute in f32, cast result back.
    m = p_ref[0, 0]
    b = p_ref[0, 1]
    o_ref[...] = (x_ref[...].astype(jnp.float32) * m + b).astype(o_ref.dtype)


def _round_up(n, m):
    return ((n + m - 1) // m) * m


def _sublane_min(dtype):
    # Packed-sublane minimum for the second-to-last block dim:
    # 4-byte dtypes -> 8, 2-byte (bf16/f16) -> 16, 1-byte (int8/fp8) -> 32.
    return {4: 8, 2: 16, 1: 32}.get(jnp.dtype(dtype).itemsize, 8)


def _line_2d(x2d, params, block_shape):
    rows, cols = x2d.shape
    br, bc = block_shape
    itemsize = jnp.dtype(x2d.dtype).itemsize
    grid = (pl.cdiv(rows, br), pl.cdiv(cols, bc))
    return pl.pallas_call(
        line_kernel,
        out_shape=jax.ShapeDtypeStruct((rows, cols), x2d.dtype),
        grid_spec=pltpu.PrefetchScalarGridSpec(
            num_scalar_prefetch=0,
            grid=grid,
            in_specs=[
                pl.BlockSpec((1, 2), lambda i, j: (0, 0),
                             memory_space=pltpu.SMEM),           # [m, b]
                pl.BlockSpec((br, bc), lambda i, j: (i, j)),     # x tile
            ],
            out_specs=pl.BlockSpec((br, bc), lambda i, j: (i, j)),
        ),
        compiler_params=pltpu.CompilerParams(
            # Independent tiles: shard grid steps across TCs on v7x megacore.
            dimension_semantics=("parallel", "parallel"),
            vmem_limit_bytes=_VMEM_LIMIT_BYTES,
        ),
        cost_estimate=pl.CostEstimate(
            flops=2 * rows * cols,
            transcendentals=0,
            bytes_accessed=2 * rows * cols * itemsize,
        ),
    )(params, x2d)


@functools.partial(jax.jit, static_argnames=("block_bytes",))
def line_forward(x, m, b, *, block_bytes=_MAX_BLOCK_BYTES):
    """y = x * m + b, elementwise.  x: any shape; m, b: scalar parameters."""
    orig_shape = x.shape
    dtype = x.dtype
    total = x.size
    itemsize = jnp.dtype(dtype).itemsize

    if total == 0:
        return x

    # Parameters stay f32 regardless of x dtype (PyTorch-style promotion).
    params = jnp.stack([
        jnp.asarray(m, jnp.float32).reshape(()),
        jnp.asarray(b, jnp.float32).reshape(()),
    ]).reshape(1, 2)

    x_flat = jnp.ravel(x)

    if total % _LANES == 0:
        # Lane-aligned fast path: zero-copy (rows, 128) view.
        rows = total // _LANES
        sub = _sublane_min(dtype)
        tile_rows = max(sub, (block_bytes // (_LANES * itemsize)) // sub * sub)
        if rows > sub:
            # Keep >= 2 grid steps so both TensorCores get work on v7x.
            tile_rows = min(tile_rows,
                            max(sub, _round_up(pl.cdiv(rows, 2), sub)))
        tile_rows = min(tile_rows, _round_up(rows, sub))
        out = _line_2d(x_flat.reshape(rows, _LANES), params,
                       (tile_rows, _LANES))
    else:
        # Ragged path: zero-copy (1, total) lane-major view; only the last
        # lane-block is partial and Pallas masks it.  The VMEM block is ~8x
        # the data (1 of 8 sublanes used), so cap data per block at
        # block_bytes // 8 to respect the VMEM budget.
        tile_cols = max(_LANES,
                        (block_bytes // (8 * itemsize)) // _LANES * _LANES)
        if total > _LANES:
            # Keep >= 2 grid steps where possible (v7x megacore).
            tile_cols = min(tile_cols,
                            max(_LANES, _round_up(pl.cdiv(total, 2), _LANES)))
        tile_cols = min(tile_cols, _round_up(total, _LANES))
        out = _line_2d(x_flat.reshape(1, total), params, (1, tile_cols))

    return out.reshape(orig_shape)


if __name__ == "__main__":
    key = jax.random.PRNGKey(0)
    k_x, k_m, k_b = jax.random.split(key, 3)

    # Deterministic "parameters" (torch.rand(1) equivalents).
    m = jax.random.uniform(k_m, (1,), dtype=jnp.float32)
    b = jax.random.uniform(k_b, (1,), dtype=jnp.float32)

    # NCHW-like input: lane-aligned fast path, multi-block (megacore) grid.
    x = jax.random.normal(k_x, (2, 4, 16, 16), dtype=jnp.float32)
    y = line_forward(x, m, b)
    jax.block_until_ready(y)
    y_ref = x * m[0] + b[0]
    assert y.shape == x.shape and y.dtype == x.dtype
    assert jnp.allclose(y, y_ref, atol=1e-6, rtol=1e-6)

    # Ragged (non-128-multiple) shape: masked partial lane block, no pad/slice.
    x2 = jax.random.normal(k_x, (3, 5, 7), dtype=jnp.float32)
    y2 = line_forward(x2, m, b)
    jax.block_until_ready(y2)
    assert y2.shape == x2.shape
    assert jnp.allclose(y2, x2 * m[0] + b[0], atol=1e-6, rtol=1e-6)

    # bf16 input: params stay f32, only the final result is cast.
    x3 = jax.random.normal(k_x, (2, 4, 16, 16), dtype=jnp.bfloat16)
    y3 = line_forward(x3, m, b)
    jax.block_until_ready(y3)
    y3_ref = (x3.astype(jnp.float32) * m[0] + b[0]).astype(jnp.bfloat16)
    assert y3.dtype == jnp.bfloat16
    assert jnp.allclose(y3.astype(jnp.float32), y3_ref.astype(jnp.float32),
                        atol=1e-2, rtol=1e-2)

    print("KERNEL_OK")
</pallas_src>

<mosaic_0001>
module attributes {stable_mosaic.version = 11 : i64} {
  func.func @line_kernel(%arg0: i32, %arg1: i32, %arg2: memref<1x2xf32, #tpu.memory_space<smem>>, %arg3: memref<8x128xf32, #tpu.memory_space<vmem>>, %arg4: memref<8x128xf32, #tpu.memory_space<vmem>>) attributes {dimension_semantics = [#tpu.dimension_semantics<parallel>, #tpu.dimension_semantics<parallel>], iteration_bounds = array<i64: 2, 1>, scalar_prefetch = 0 : i64, scratch_operands = 0 : i64, tpu.core_type = #tpu.core_type<tc>, window_params = [{transform_indices = @transform_0, window_bounds = array<i64: 1, 2>}, {transform_indices = @transform_1, window_bounds = array<i64: 8, 128>}, {transform_indices = @transform_2, window_bounds = array<i64: 8, 128>}]} {
    %c0 = arith.constant 0 : index
    %c0_0 = arith.constant 0 : index
    %0 = memref.load %arg2[%c0, %c0_0] : memref<1x2xf32, #tpu.memory_space<smem>>
    %c0_1 = arith.constant 0 : index
    %c1 = arith.constant 1 : index
    %1 = memref.load %arg2[%c0_1, %c1] : memref<1x2xf32, #tpu.memory_space<smem>>
    %c0_2 = arith.constant 0 : index
    %c0_3 = arith.constant 0 : index
    %2 = vector.load %arg3[%c0_2, %c0_3] : memref<8x128xf32, #tpu.memory_space<vmem>>, vector<8x128xf32>
    %3 = vector.broadcast %0 : f32 to vector<8x128xf32>
    %4 = arith.mulf %2, %3 : vector<8x128xf32>
    %5 = vector.broadcast %1 : f32 to vector<8x128xf32>
    %6 = arith.addf %4, %5 : vector<8x128xf32>
    %c0_4 = arith.constant 0 : index
    %c0_5 = arith.constant 0 : index
    %7 = vector.load %arg4[%c0_4, %c0_5] : memref<8x128xf32, #tpu.memory_space<vmem>>, vector<8x128xf32>
    tpu.vector_store %arg4[%c0_4, %c0_5], %6 {strides = array<i32>} : memref<8x128xf32, #tpu.memory_space<vmem>>, vector<8x128xf32>,
    return
  }
  func.func @transform_0(%arg0: i32, %arg1: i32) -> (i32, i32) {
    %c0_i32 = arith.constant 0 : i32
    %c0_i32_0 = arith.constant 0 : i32
    %c0_i32_1 = arith.constant 0 : i32
    return %c0_i32, %c0_i32_0 : i32, i32
  }
  func.func @transform_1(%arg0: i32, %arg1: i32) -> (i32, i32) {
    %c0_i32 = arith.constant 0 : i32
    return %arg0, %arg1 : i32, i32
  }
  func.func @transform_2(%arg0: i32, %arg1: i32) -> (i32, i32) {
    %c0_i32 = arith.constant 0 : i32
    return %arg0, %arg1 : i32, i32
  }
}

</mosaic_0001>

<bundles_post_ra>
// kernel: line_forward.1
= control target key start
LH: loop header
LB: loop body
LE: loop exit
PB: predicated region body
PF: predicated region fallthrough
CT: control target
= control target key end

     0   :  { %7 = vsyncpa [#allocation3], 0  ;;  %s385_s9 = smov 0   ;;  %s387_s10 = smov 0   ;;  %s422_s0 = inlined_call_operand.vmem [shape: f32[1,2], index: 0, kind: input, shape index: {}]   ;;  %s423_s1 = inlined_call_operand.vmem [shape: f32[16,128], index: 1, kind: input, shape index: {}]   ;;  %s424_s2 = inlined_call_operand.vmem [shape: f32[16,128], index: 2, kind: output, shape index: {}]  }
   0x1   :  { %s389_s11 = smov 0  }
   0x2 LB: > { %s279_s12 = sadd.s32 4294967295, %s367_s11   ;;  %s25_s13 = sadd.s32 1, %s363_s10  ;;  %s367_s11 = sphi %s389_s11, %s13_s11   ;;  %s363_s10 = sphi %s387_s10, %s426_s10   ;;  %s359_s9 = sphi %s385_s9, %s425_s9  }
   0x3   : > { %p27_p0 = scmp.ge.s32.totalorder %s25_s13, 2  ;;  %p281_p1 = scmp.ge.s32.totalorder %s367_s11, 1 }
   0x4   : > { %p107_p2 = scmp.lt.s32.totalorder %s367_s11, 3  ;;  %p299_p4 = scmp.eq.s32.totalorder %s279_s12, 0 }
   0x5   : > { %s428_s13 = smov (%p27_p0, %s25_s13), 0  ;;  %s119_s16 = sshll.u32 %s422_s0, 4  ;;  %s120_s16 = int_to_ptr.vmem [resolvable:$true] %s119_s16 }
   0x6   : > { %p108_p3 = pnand %p281_p1, %p107_p2  ;;  %s369_s17 = smov [#allocation2]  }
   0x8   : > { %p295_p5 = pneg %p108_p3  ;;  %142 = sbr.rel (%p108_p3) target bundleno = 28 (0x1c), region = 28 }
   0xa   : > { %p296_p6 = pnand %p299_p4, %p295_p5 }
   0xc   : > { %298 = dma.vmem_to_smem (!%p296_p6), %s120_s16, 16, %s369_s17, [#allocation3]  }
   0xd   : > { %354 = dma.done.wait (%p299_p4), [#allocation3], 16  }
   0xe   : > { %356 = vsyncadd (%p299_p4), [#allocation3], 4294967280 }
   0xf   : > { %149 = sfence }
  0x10   : > { %p170_p7 = scmp.lt.s32.totalorder %s359_s9, 1  ;;  %s184_s18 = sld [smem:[#allocation2]] }
  0x11   : > { %s288_s19 = sld [smem:[#allocation2 + $0x1]] }
  0x12   : > { %s430_s9 = smov (!%p170_p7, %s359_s9), 1 }
  0x13   : > { %s286_s20 = sshll.u32 %s430_s9, 3 }
  0x14   : > { %s176_s23 = scalar_lea.vmem %s423_s1, %s286_s20  ;;  %s183_s26 = scalar_lea.vmem %s424_s2, %s286_s20 }
  0x15   : > { %v186_v0 = vld [vmem:[%s176_s23] sm:$0xff] }
  0x16   : > { %v187_v1 = vstv %s184_s18 }
  0x17   : > { %v188_v2 = vmul.f32 %v187_v1, %v186_v0  ;;  %v189_v3 = vstv %s288_s19 }
  0x19   : > { %v190_v4 = vadd.f32 %v189_v3, %v188_v2 }
  0x1b   : > { %191 = vst [vmem:[%s183_s26] sm:$0xff] %v190_v4 }
  0x1c PF: > { %s13_s11 = sadd.s32 1, %s367_s11   ;;  %s425_s9 = smov %s363_s10 }
  0x1d   : > { %p10_p8 = scmp.ge.s32.totalorder %s13_s11, 4   ;;  %s426_s10 = smov %s428_s13 }
  0x1f   :  { %12 = sbr.rel (!%p10_p8) target bundleno = 2 (0x2), region = 63 }
  0x24   :  { %217 = vsyncpa [#allocation3], 1 }
  0x25   :  { %219 = vsyncpa [#allocation3 + $0x1], 1 }

</bundles_post_ra>
